<compile_context>
chip_gen: v7x
topology: tpu7x:2x2x1
jax: 0.10.0
libtpu: 0.0.40
codegen_flags: <defaults>
</compile_context>

<pallas_src>
import functools

import jax
import jax.numpy as jnp
from jax.experimental import pallas as pl
from jax.experimental.pallas import tpu as pltpu


def model_kernel(tok_ref, tbl_ref, wcls_ref, bcls_ref, out_ref, *,
                 seq_len, kernel_size, vocab_rows, hidden, pooling):
    # tok_ref : (Bt, S+2p)        int32  zero-padded tokens (halo = zero-row id)
    # tbl_ref : (K, V_rows, H)    bf16   fused tables  tbl[k] = emb @ W_conv[k]
    # wcls_ref: (H, C_pad)        bf16   classifier weight (lane-dense padded)
    # bcls_ref: (1, C_pad)        f32    classifier bias   (lane-dense padded)
    # out_ref : (Bt, C_pad)       f32    logits
    tok = tok_ref[...]                                   # (Bt, S+2p)
    bt, sp = tok.shape

    # ONE one-hot over all padded positions; tap one-hots are static slices.
    iota_v = jax.lax.broadcasted_iota(jnp.int32, (bt, sp, vocab_rows), 2)
    onehot = (tok[:, :, None] == iota_v).astype(jnp.bfloat16)   # (Bt, S+2p, V)

    # conv[b,s] = sum_k emb[tok_pad[b,s+k]] @ W_k = sum_k onehot_k @ tbl[k],
    # accumulated directly in f32 (no im2col concat, no second matmul).
    conv = jnp.zeros((bt * seq_len, hidden), jnp.float32)
    for k in range(kernel_size):                         # static, tiny trip count
        oh_k = onehot[:, k:k + seq_len, :].reshape(bt * seq_len, vocab_rows)
        conv = conv + jnp.dot(oh_k, tbl_ref[k],
                              preferred_element_type=jnp.float32)
    conv = conv.reshape(bt, seq_len, hidden)             # (Bt, S, H)

    # Pooling over the sequence dim (MaxPool1d(S) / AvgPool1d(S) + squeeze).
    if pooling == "max":
        pooled = jnp.max(conv, axis=1)                   # (Bt, H)
    else:
        pooled = jnp.sum(conv, axis=1) * (1.0 / seq_len)

    # classify: Linear(H, C) on a lane-dense (128-wide) padded output.
    logits = jnp.dot(pooled.astype(jnp.bfloat16), wcls_ref[...],
                     preferred_element_type=jnp.float32) + bcls_ref[...]
    out_ref[...] = logits


def torch_model_forward(tokens, emb, w_conv, w_cls, b_cls, *,
                        pooling="max", batch_tile=None):
    """tokens:(B,S) int32; emb:(V+1,H) f32; w_conv:(K,H,H) [tap,in,out];
    w_cls:(H,C); b_cls:(1,C).  batch_tile=None => single whole-batch tile."""
    B, S = tokens.shape
    V1, H = emb.shape
    K = w_conv.shape[0]
    pad = (K - 1) // 2
    C = w_cls.shape[1]
    C_pad = ((C + 127) // 128) * 128

    # ---- one-time weight prep: fold conv into the embedding table ----
    zero_row_id = V1                                     # id of appended zero row
    vocab_rows = V1 + 1
    emb_k = jnp.concatenate(
        [emb.astype(jnp.bfloat16), jnp.zeros((1, H), jnp.bfloat16)], axis=0)
    # tbl[k] = emb_k @ W_k   (fused gather+conv tables), bf16 in VMEM
    tbl = jnp.einsum(
        "vh,khj->kvj",
        emb_k.astype(jnp.float32),
        w_conv.astype(jnp.bfloat16).astype(jnp.float32),
        precision=jax.lax.Precision.HIGHEST).astype(jnp.bfloat16)   # (K, V, H)
    w_cls_pad = jnp.zeros((H, C_pad), jnp.bfloat16).at[:, :C].set(
        w_cls.astype(jnp.bfloat16))
    b_cls_pad = jnp.zeros((1, C_pad), jnp.float32).at[:, :C].set(
        b_cls.astype(jnp.float32))

    # ---- token plumbing: contiguous (B, S+2p) int32; halo = zero-row id ----
    tok_pad = jnp.pad(tokens.astype(jnp.int32), ((0, 0), (pad, pad)),
                      constant_values=zero_row_id)                   # (B, S+2p)

    Bt = B if batch_tile is None else min(batch_tile, B)
    assert B % Bt == 0, "batch must be divisible by the batch tile"

    kernel = functools.partial(model_kernel, seq_len=S, kernel_size=K,
                               vocab_rows=vocab_rows, hidden=H, pooling=pooling)

    out_padded = pl.pallas_call(
        kernel,
        out_shape=jax.ShapeDtypeStruct((B, C_pad), jnp.float32),
        grid=(B // Bt,),
        in_specs=[
            pl.BlockSpec((Bt, S + 2 * pad), lambda i: (i, 0)),     # padded tokens
            pl.BlockSpec((K, vocab_rows, H), lambda i: (0, 0, 0)), # fused tables
            pl.BlockSpec((H, C_pad), lambda i: (0, 0)),            # classifier W
            pl.BlockSpec((1, C_pad), lambda i: (0, 0)),            # classifier b
        ],
        out_specs=pl.BlockSpec((Bt, C_pad), lambda i: (i, 0)),
        compiler_params=pltpu.CompilerParams(
            dimension_semantics=("parallel",)),        # only matters when Bt < B
    )(tok_pad, tbl, w_cls_pad, b_cls_pad)

    return out_padded[:, :C]


def reference_forward(tokens, emb, w_conv, w_cls, b_cls, *, pooling="max"):
    """f32 reference mirroring the kernel's bf16 weight casts (un-fused path)."""
    hp = jax.lax.Precision.HIGHEST
    emb_f = emb.astype(jnp.bfloat16).astype(jnp.float32)
    wc = w_conv.astype(jnp.bfloat16).astype(jnp.float32)
    wcl = w_cls.astype(jnp.bfloat16).astype(jnp.float32)

    x = jnp.take(emb_f, tokens, axis=0)                             # (B,S,H)
    K = w_conv.shape[0]
    pad = (K - 1) // 2
    S = x.shape[1]
    xp = jnp.pad(x, ((0, 0), (pad, pad), (0, 0)))                   # zero act pad
    conv = sum(jnp.einsum("bsh,hk->bsk", xp[:, k:k + S, :], wc[k], precision=hp)
               for k in range(K))
    pooled = jnp.max(conv, axis=1) if pooling == "max" else jnp.mean(conv, axis=1)
    pooled = pooled.astype(jnp.bfloat16).astype(jnp.float32)
    return jnp.dot(pooled, wcl, precision=hp) + b_cls


if __name__ == "__main__":
    # config (synthetic, matches the module's __init__ shape logic)
    hidden_size = 32
    vocab_size = 30              # embedding table gets vocab_size + 1 rows
    class_num = 5
    kernel_size = 3              # CNN encoder
    pooling_style = "max"
    B, S = 16, 8                 # single whole-batch tile (grid=(1,))

    key = jax.random.PRNGKey(0)
    k_emb, k_conv, k_cls_w, k_cls_b, k_tok = jax.random.split(key, 5)

    # nn.Embedding(vocab_size + 1, hidden_size, padding_idx=0)
    emb = 0.02 * jax.random.normal(k_emb, (vocab_size + 1, hidden_size), jnp.float32)
    emb = emb.at[0].set(0.0)     # padding_idx=0 -> zero row

    # nn.Conv1d(H, H, K, bias=False): torch weight (out, in, K) -> (K, in, out)
    w_conv_torch = 0.05 * jax.random.normal(
        k_conv, (hidden_size, hidden_size, kernel_size), jnp.float32)
    w_conv = jnp.transpose(w_conv_torch, (2, 1, 0))

    # nn.Linear(H, class_num): torch weight (C, H) -> (H, C), bias (C,) -> (1, C)
    w_cls_torch = 0.05 * jax.random.normal(k_cls_w, (class_num, hidden_size), jnp.float32)
    w_cls = w_cls_torch.T
    b_cls = 0.01 * jax.random.normal(k_cls_b, (1, class_num), jnp.float32)

    tokens = jax.random.randint(k_tok, (B, S), 0, vocab_size + 1, dtype=jnp.int32)

    out = torch_model_forward(tokens, emb, w_conv, w_cls, b_cls,
                              pooling=pooling_style, batch_tile=None)
    out = jax.block_until_ready(out)

    ref = reference_forward(tokens, emb, w_conv, w_cls, b_cls,
                            pooling=pooling_style)
    assert out.shape == (B, class_num)
    assert jnp.allclose(out, ref, atol=3e-3, rtol=2e-2), "mismatch vs reference"

    # TODO(synk): lstm/gru/rnn/bert/bert_lstm encoder variants and the
    # cross-entropy training path of TorchModel are not implemented; this
    # covers the model_type='cnn' inference path end-to-end.
    print("KERNEL_OK")
</pallas_src>

<mosaic_0001>
module attributes {stable_mosaic.version = 11 : i64} {
  func.func @model_kernel(%arg0: i32, %arg1: memref<16x10xi32, #tpu.memory_space<vmem>>, %arg2: memref<3x32x32xbf16, #tpu.memory_space<vmem>>, %arg3: memref<32x128xbf16, #tpu.memory_space<vmem>>, %arg4: memref<1x128xf32, #tpu.memory_space<vmem>>, %arg5: memref<16x128xf32, #tpu.memory_space<vmem>>) attributes {dimension_semantics = [#tpu.dimension_semantics<parallel>], iteration_bounds = array<i64: 1>, scalar_prefetch = 0 : i64, scratch_operands = 0 : i64, tpu.core_type = #tpu.core_type<tc>, window_params = [{transform_indices = @transform_0, window_bounds = array<i64: 16, 10>}, {pipeline_mode = #tpu.pipeline_mode<synchronous>, transform_indices = @transform_1, window_bounds = array<i64: 3, 32, 32>}, {pipeline_mode = #tpu.pipeline_mode<synchronous>, transform_indices = @transform_2, window_bounds = array<i64: 32, 128>}, {pipeline_mode = #tpu.pipeline_mode<synchronous>, transform_indices = @transform_3, window_bounds = array<i64: 1, 128>}, {transform_indices = @transform_4, window_bounds = array<i64: 16, 128>}]} {
    %c0 = arith.constant 0 : index
    %c0_0 = arith.constant 0 : index
    %0 = vector.load %arg1[%c0, %c0_0] : memref<16x10xi32, #tpu.memory_space<vmem>>, vector<16x10xi32>
    %1 = tpu.iota {dimensions = array<i32: 2>} : vector<16x10x32xi32>
    %2 = vector.shape_cast %0 : vector<16x10xi32> to vector<16x10x1xi32>
    %3 = vector.broadcast %2 : vector<16x10x1xi32> to vector<16x10x32xi32>
    %4 = arith.cmpi eq, %3, %1 : vector<16x10x32xi32>
    %5 = arith.extui %4 : vector<16x10x32xi1> to vector<16x10x32xi32>
    %6 = arith.sitofp %5 : vector<16x10x32xi32> to vector<16x10x32xf32>
    %7 = arith.truncf %6 : vector<16x10x32xf32> to vector<16x10x32xbf16>
    %cst = arith.constant 0.000000e+00 : f32
    %8 = vector.broadcast %cst : f32 to vector<128x32xf32>
    %9 = vector.extract_strided_slice %7 {offsets = [0, 0, 0], sizes = [16, 8, 32], strides = [1, 1, 1]} : vector<16x10x32xbf16> to vector<16x8x32xbf16>
    %10 = vector.shape_cast %9 : vector<16x8x32xbf16> to vector<128x32xbf16>
    %c0_1 = arith.constant 0 : index
    %c0_2 = arith.constant 0 : index
    %c0_3 = arith.constant 0 : index
    %11 = vector.load %arg2[%c0_1, %c0_2, %c0_3] : memref<3x32x32xbf16, #tpu.memory_space<vmem>>, vector<1x32x32xbf16>
    %12 = vector.shape_cast %11 : vector<1x32x32xbf16> to vector<32x32xbf16>
    %cst_4 = arith.constant dense<0.000000e+00> : vector<128x32xf32>
    %13 = tpu.matmul %10, %12, %cst_4 {dimension_numbers = #tpu.dot_dimension_numbers<[1], [0], [0], [1], [0, 0, 1, 1], [], []>} : vector<128x32xbf16>, vector<32x32xbf16>, vector<128x32xf32> -> vector<128x32xf32>
    %14 = arith.addf %8, %13 : vector<128x32xf32>
    %15 = vector.extract_strided_slice %7 {offsets = [0, 1, 0], sizes = [16, 8, 32], strides = [1, 1, 1]} : vector<16x10x32xbf16> to vector<16x8x32xbf16>
    %16 = vector.shape_cast %15 : vector<16x8x32xbf16> to vector<128x32xbf16>
    %c1 = arith.constant 1 : index
    %c0_5 = arith.constant 0 : index
    %c0_6 = arith.constant 0 : index
    %17 = vector.load %arg2[%c1, %c0_5, %c0_6] : memref<3x32x32xbf16, #tpu.memory_space<vmem>>, vector<1x32x32xbf16>
    %18 = vector.shape_cast %17 : vector<1x32x32xbf16> to vector<32x32xbf16>
    %cst_7 = arith.constant dense<0.000000e+00> : vector<128x32xf32>
    %19 = tpu.matmul %16, %18, %cst_7 {dimension_numbers = #tpu.dot_dimension_numbers<[1], [0], [0], [1], [0, 0, 1, 1], [], []>} : vector<128x32xbf16>, vector<32x32xbf16>, vector<128x32xf32> -> vector<128x32xf32>
    %20 = arith.addf %14, %19 : vector<128x32xf32>
    %21 = vector.extract_strided_slice %7 {offsets = [0, 2, 0], sizes = [16, 8, 32], strides = [1, 1, 1]} : vector<16x10x32xbf16> to vector<16x8x32xbf16>
    %22 = vector.shape_cast %21 : vector<16x8x32xbf16> to vector<128x32xbf16>
    %c2 = arith.constant 2 : index
    %c0_8 = arith.constant 0 : index
    %c0_9 = arith.constant 0 : index
    %23 = vector.load %arg2[%c2, %c0_8, %c0_9] : memref<3x32x32xbf16, #tpu.memory_space<vmem>>, vector<1x32x32xbf16>
    %24 = vector.shape_cast %23 : vector<1x32x32xbf16> to vector<32x32xbf16>
    %cst_10 = arith.constant dense<0.000000e+00> : vector<128x32xf32>
    %25 = tpu.matmul %22, %24, %cst_10 {dimension_numbers = #tpu.dot_dimension_numbers<[1], [0], [0], [1], [0, 0, 1, 1], [], []>} : vector<128x32xbf16>, vector<32x32xbf16>, vector<128x32xf32> -> vector<128x32xf32>
    %26 = arith.addf %20, %25 : vector<128x32xf32>
    %27 = vector.shape_cast %26 : vector<128x32xf32> to vector<16x8x32xf32>
    %cst_11 = arith.constant dense<0xFF800000> : vector<16x32xf32>
    %28 = vector.multi_reduction <maximumf>, %27, %cst_11 [1] : vector<16x8x32xf32> to vector<16x32xf32>
    %29 = arith.truncf %28 : vector<16x32xf32> to vector<16x32xbf16>
    %c0_12 = arith.constant 0 : index
    %c0_13 = arith.constant 0 : index
    %30 = vector.load %arg3[%c0_12, %c0_13] : memref<32x128xbf16, #tpu.memory_space<vmem>>, vector<32x128xbf16>
    %cst_14 = arith.constant dense<0.000000e+00> : vector<16x128xf32>
    %31 = tpu.matmul %29, %30, %cst_14 {dimension_numbers = #tpu.dot_dimension_numbers<[1], [0], [0], [1], [0, 0, 1, 1], [], []>} : vector<16x32xbf16>, vector<32x128xbf16>, vector<16x128xf32> -> vector<16x128xf32>
    %c0_15 = arith.constant 0 : index
    %c0_16 = arith.constant 0 : index
    %32 = vector.load %arg4[%c0_15, %c0_16] : memref<1x128xf32, #tpu.memory_space<vmem>>, vector<1x128xf32>
    %33 = vector.broadcast %32 : vector<1x128xf32> to vector<16x128xf32>
    %34 = arith.addf %31, %33 : vector<16x128xf32>
    %c0_17 = arith.constant 0 : index
    %c0_18 = arith.constant 0 : index
    %35 = vector.load %arg5[%c0_17, %c0_18] : memref<16x128xf32, #tpu.memory_space<vmem>>, vector<16x128xf32>
    tpu.vector_store %arg5[%c0_17, %c0_18], %34 {strides = array<i32>} : memref<16x128xf32, #tpu.memory_space<vmem>>, vector<16x128xf32>,
    return
  }
  func.func @transform_0(%arg0: i32) -> (i32, i32) {
    %c0_i32 = arith.constant 0 : i32
    %c0_i32_0 = arith.constant 0 : i32
    return %arg0, %c0_i32 : i32, i32
  }
  func.func @transform_1(%arg0: i32) -> (i32, i32, i32) {
    %c0_i32 = arith.constant 0 : i32
    %c0_i32_0 = arith.constant 0 : i32
    %c0_i32_1 = arith.constant 0 : i32
    %c0_i32_2 = arith.constant 0 : i32
    return %c0_i32, %c0_i32_0, %c0_i32_1 : i32, i32, i32
  }
  func.func @transform_2(%arg0: i32) -> (i32, i32) {
    %c0_i32 = arith.constant 0 : i32
    %c0_i32_0 = arith.constant 0 : i32
    %c0_i32_1 = arith.constant 0 : i32
    return %c0_i32, %c0_i32_0 : i32, i32
  }
  func.func @transform_3(%arg0: i32) -> (i32, i32) {
    %c0_i32 = arith.constant 0 : i32
    %c0_i32_0 = arith.constant 0 : i32
    %c0_i32_1 = arith.constant 0 : i32
    return %c0_i32, %c0_i32_0 : i32, i32
  }
  func.func @transform_4(%arg0: i32) -> (i32, i32) {
    %c0_i32 = arith.constant 0 : i32
    %c0_i32_0 = arith.constant 0 : i32
    return %arg0, %c0_i32 : i32, i32
  }
}

</mosaic_0001>

<bundles_post_ra>
// kernel: tpu_custom_call.1
= control target key start
LH: loop header
LB: loop body
LE: loop exit
PB: predicated region body
PF: predicated region fallthrough
CT: control target
= control target key end

     0   :  { %9 = vsyncpa [#allocation3], 0  ;;  %s2389_s0 = inlined_call_operand.hbm [shape: s32[16,10], index: 0, kind: input, shape index: {}]   ;;  %s2390_s1 = inlined_call_operand.hbm [shape: bf16[3,32,32], index: 1, kind: input, shape index: {}]   ;;  %s2391_s2 = inlined_call_operand.hbm [shape: bf16[32,128], index: 2, kind: input, shape index: {}]   ;;  %s2392_s3 = inlined_call_operand.vmem [shape: f32[1,128], index: 3, kind: input, shape index: {}]   ;;  %s2393_s4 = inlined_call_operand.hbm [shape: f32[16,128], index: 4, kind: output, shape index: {}]  }
   0x1   :  { %10 = vsyncpa [#allocation6], 0 }
   0x2   :  { %11 = vsyncpa [#allocation4], 0  ;;  %s1908_s15 = smov [#allocation5]   ;;  %s1814_s19 = scalar_lea.hbm %s2390_s1, 768 }
   0x3   :  { %s29_s16 = sshll.u32 %s1908_s15, 4  ;;  %p1815_p0 = scmp.ne.s32.totalorder %s2390_s1, %s1814_s19  ;;  %s30_s16 = int_to_ptr.vmem [resolvable:$true] %s29_s16 }
   0x4   :  { %p1818_p1 = scmp.lt.u32.totalorder %s1814_s19, %s2390_s1 }
   0x6   :  { %p1820_p2 = pnand %p1818_p1, %p1815_p0 }
   0x8   :  { %1823 = shalt.err (!%p1820_p2)
}
   0x9   :  { %s1824_s24 = scalar_lea.vmem %s30_s16, 768  ;;  %p1829_p4 = scmp.lt.s32.totalorder %s30_s16, %s30_s16 }
   0xa   :  { %p1825_p3 = scmp.ne.s32.totalorder %s30_s16, %s1824_s24  ;;  %p1830_p5 = scmp.lt.s32.totalorder %s1824_s24, %s1824_s24 }
   0xc   :  { %p1831_p6 = por %p1830_p5, %p1829_p4 }
   0xe   :  { %p1832_p7 = pnand %p1831_p6, %p1825_p3 }
  0x10   :  { %1835 = shalt.err (!%p1832_p7)
}
  0x11   :  { %s1909_s25 = smov 64   ;;  %s1910_s26 = smov 4  }
  0x12   :  { %35 = dma.hbm_to_vmem [thread:$0]  %s2390_s1, 768, %s30_s16, [#allocation6], %s1909_s25, %s1909_s25, %s1910_s26  }
  0x13   :  { %s1911_s29 = smov [#allocation2]   ;;  %s1836_s7 = scalar_lea.hbm %s2389_s0, 256 }
  0x14   :  { %s17_s30 = sshll.u32 %s1911_s29, 4  ;;  %p1837_p8 = scmp.ne.s32.totalorder %s2389_s0, %s1836_s7  ;;  %s18_s30 = int_to_ptr.vmem [resolvable:$true] %s17_s30 }
  0x15   :  { %p1840_p9 = scmp.lt.u32.totalorder %s1836_s7, %s2389_s0 }
  0x17   :  { %p1842_p10 = pnand %p1840_p9, %p1837_p8 }
  0x19   :  { %1845 = shalt.err (!%p1842_p10)
}
  0x1a   :  { %s1846_s12 = scalar_lea.vmem %s18_s30, 256  ;;  %p1851_p12 = scmp.lt.s32.totalorder %s18_s30, %s18_s30 }
  0x1b   :  { %p1847_p11 = scmp.ne.s32.totalorder %s18_s30, %s1846_s12  ;;  %p1852_p13 = scmp.lt.s32.totalorder %s1846_s12, %s1846_s12 }
  0x1d   :  { %p1853_p0 = por %p1852_p13, %p1851_p12 }
  0x1f   :  { %p1854_p1 = pnand %p1853_p0, %p1847_p11 }
  0x21   :  { %1857 = shalt.err (!%p1854_p1)
}
  0x22   :  { %s1912_s1 = smov 128   ;;  %s1913_s13 = smov 8  }
  0x23   :  { %23 = dma.hbm_to_vmem [thread:$0]  %s2389_s0, 256, %s18_s30, [#allocation3], %s1912_s1, %s1912_s1, %s1913_s13  }
  0x24   :  { %s1914_s16 = smov [#allocation7]   ;;  %s1858_s20 = scalar_lea.hbm %s2391_s2, 256 }
  0x25   :  { %s41_s17 = sshll.u32 %s1914_s16, 4  ;;  %p1859_p2 = scmp.ne.s32.totalorder %s2391_s2, %s1858_s20  ;;  %s42_s17 = int_to_ptr.vmem [resolvable:$true] %s41_s17 }
  0x26   :  { %p1862_p3 = scmp.lt.u32.totalorder %s1858_s20, %s2391_s2 }
  0x28   :  { %p1864_p4 = pnand %p1862_p3, %p1859_p2 }
  0x2a   :  { %1867 = shalt.err (!%p1864_p4)
}
  0x2b   :  { %s1868_s27 = scalar_lea.vmem %s42_s17, 256  ;;  %p1873_p6 = scmp.lt.s32.totalorder %s42_s17, %s42_s17 }
  0x2c   :  { %p1869_p5 = scmp.ne.s32.totalorder %s42_s17, %s1868_s27  ;;  %p1874_p7 = scmp.lt.s32.totalorder %s1868_s27, %s1868_s27 }
  0x2e   :  { %p1875_p8 = por %p1874_p7, %p1873_p6 }
  0x30   :  { %p1876_p9 = pnand %p1875_p8, %p1869_p5 }
  0x32   :  { %1879 = shalt.err (!%p1876_p9)
}
  0x33   :  { %47 = dma.hbm_to_vmem [thread:$0]  %s2391_s2, 256, %s42_s17, [#allocation6], %s1909_s25, %s1909_s25, %s1910_s26  }
  0x34   :  { %1902 = dma.done.wait [#allocation3], 256  }
  0x35   :  { %1903 = vsyncadd [#allocation3], 4294967040 }
  0x36   :  { %1904 = dma.done.wait [#allocation6], 1024  }
  0x37   :  { %1905 = vsyncadd [#allocation6], 4294966272  ;;  %v62_v0 = vlaneseq  ;;  %v60_v6 = vld [vmem:[#allocation2] sm:$0xff]  ;;  %v1995_v9 = vld [vmem:[#allocation5] sm:$0xff]   ;;  %v1915_v36 = vmov 0.0   ;;  %vm967_vm4 = vcmask 1042432  }
  0x38   :  { %v1997_v10 = vld [vmem:[#allocation5 + $0x8] sm:$0xff]   ;;  %1712 = vmatprep.subr.bf16.mxu0 %v1995_v9  ;;  %v1808_v13 = vld [vmem:[#allocation5 + $0x10] sm:$0xff]   ;;  %v1809_v16 = vld [vmem:[#allocation5 + $0x18] sm:$0xff]   ;;  %vm704_vm5 = vcmask 261120   ;;  %vm968_vm6 = vcmask 1046532   ;;  %s1917_s26 = smov [#allocation8]  }
  0x39   :  { %v1989_v1 = vshrl.u32 %v62_v0, 7  ;;  %1713 = vmatpush3.bf16.msra.mxu0 %v1995_v9  ;;  %1692 = vmatprep.subr.bf16.mxu1 %v1808_v13  ;;  %v61_v23 = vld [vmem:[#allocation2 + $0x8] sm:$0xff]  ;;  %v2008_v28 = vld [vmem:[#allocation5 + $0x20] sm:$0xff]   ;;  %v2012_v33 = vand.u32 127, %v62_v0  ;;  %vm436_vm10 = vsmask.f32 3328  ;;  %vm2053_vm13 = vmor %vm967_vm4, %vm968_vm6 }
  0x3a   :  { %1714 = vmatprep.subr.bf16.mxu0 %v1997_v10  ;;  %1693 = vmatpush3.bf16.msra.mxu1 %v1808_v13  ;;  %vm437_vm11 = vsmask.f32 7440  ;;  %s1468_s29 = sshll.u32 %s1917_s26, 4  ;;  %s1469_s29 = int_to_ptr.vmem [resolvable:$true] %s1468_s29 }
  0x3b   :  { %v88_v2 = vsub.s32 2, %v1989_v1  ;;  %v66_v3 = vsub.s32 0, %v1989_v1  ;;  %v99_v4 = vsub.s32 3, %v1989_v1  ;;  %v77_v5 = vsub.s32 1, %v1989_v1  ;;  %1694 = vmatprep.subr.bf16.mxu1 %v1809_v16  ;;  %s1880_s30 = scalar_lea.vmem %s1469_s29, 256  ;;  %p1885_p11 = scmp.lt.s32.totalorder %s1469_s29, %s1469_s29 }
  0x3c   :  { %v121_v14 = vsub.s32 5, %v1989_v1  ;;  %v110_v15 = vsub.s32 4, %v1989_v1  ;;  %v143_v19 = vsub.s32 7, %v1989_v1  ;;  %v132_v20 = vsub.s32 6, %v1989_v1  ;;  %p1881_p10 = scmp.ne.s32.totalorder %s1469_s29, %s1880_s30  ;;  %p1886_p12 = scmp.lt.s32.totalorder %s1880_s30, %s1880_s30 }
  0x3d   :  { %v89_v7 = vrot.slane %v60_v6, %v88_v2  ;;  %v67_v8 = vrot.slane %v60_v6, %v66_v3  ;;  %v100_v11 = vrot.slane %v60_v6, %v99_v4  ;;  %v78_v12 = vrot.slane %v60_v6, %v77_v5  ;;  %1715 = vmatpush3.bf16.msra.mxu0 %v1997_v10 }
  0x3e   :  { %v122_v17 = vrot.slane %v60_v6, %v121_v14  ;;  %v111_v18 = vrot.slane %v60_v6, %v110_v15  ;;  %1695 = vmatpush3.bf16.msra.mxu1 %v1809_v16  ;;  %v144_v21 = vrot.slane %v60_v6, %v143_v19  ;;  %v133_v22 = vrot.slane %v60_v6, %v132_v20  ;;  %p1887_p13 = por %p1886_p12, %p1885_p11 }
  0x3f   :  { %91 = vbcast.lane.b32.xlu1 %v89_v7, 256  ;;  %69 = vbcast.lane.b32.xlu0 %v67_v8, 256  ;;  %v166_v24 = vrot.slane %v61_v23, %v77_v5  ;;  %v155_v25 = vrot.slane %v61_v23, %v66_v3  ;;  %v188_v26 = vrot.slane %v61_v23, %v99_v4 }
  0x40   :  { %1760 = vmatprep.subr.bf16.mxu1 %v1995_v9  ;;  %v177_v27 = vrot.slane %v61_v23, %v88_v2  ;;  %1732 = vmatprep.subr.bf16.mxu0 %v2008_v28  ;;  %v210_v29 = vrot.slane %v61_v23, %v121_v14  ;;  %v199_v30 = vrot.slane %v61_v23, %v110_v15  ;;  %v1811_v15 = vld [vmem:[#allocation5 + $0x28] sm:$0xff]   ;;  %p1888_p0 = pnand %p1887_p13, %p1881_p10 }
  0x41   :  { %v232_v31 = vrot.slane %v61_v23, %v143_v19  ;;  %v221_v32 = vrot.slane %v61_v23, %v132_v20 }
  0x43   :  { %102 = vbcast.lane.b32.xlu1 %v100_v11, 256  ;;  %80 = vbcast.lane.b32.xlu0 %v78_v12, 256 }
  0x47   :  { %84 = vbcast.lane.b32.xlu1 %v78_v12, 264  ;;  %73 = vbcast.lane.b32.xlu0 %v67_v8, 264 }
  0x4b   :  { %106 = vbcast.lane.b32.xlu1 %v100_v11, 264  ;;  %95 = vbcast.lane.b32.xlu0 %v89_v7, 264 }
  0x4f   :  { %124 = vbcast.lane.b32.xlu1 %v122_v17, 256  ;;  %113 = vbcast.lane.b32.xlu0 %v111_v18, 256 }
  0x53   :  { %146 = vbcast.lane.b32.xlu1 %v144_v21, 256  ;;  %135 = vbcast.lane.b32.xlu0 %v133_v22, 256 }
  0x57   :  { %128 = vbcast.lane.b32.xlu1 %v122_v17, 264  ;;  %117 = vbcast.lane.b32.xlu0 %v111_v18, 264 }
  0x5b   :  { %150 = vbcast.lane.b32.xlu1 %v144_v21, 264  ;;  %139 = vbcast.lane.b32.xlu0 %v133_v22, 264 }
  0x5f   :  { %168 = vbcast.lane.b32.xlu1 %v166_v24, 256  ;;  %157 = vbcast.lane.b32.xlu0 %v155_v25, 256 }
  0x63   :  { %190 = vbcast.lane.b32.xlu1 %v188_v26, 256  ;;  %179 = vbcast.lane.b32.xlu0 %v177_v27, 256 }
  0x67   :  { %172 = vbcast.lane.b32.xlu1 %v166_v24, 264  ;;  %161 = vbcast.lane.b32.xlu0 %v155_v25, 264 }
  0x6b   :  { %194 = vbcast.lane.b32.xlu1 %v188_v26, 264  ;;  %183 = vbcast.lane.b32.xlu0 %v177_v27, 264 }
  0x6f   :  { %212 = vbcast.lane.b32.xlu1 %v210_v29, 256  ;;  %201 = vbcast.lane.b32.xlu0 %v199_v30, 256 }
  0x73   :  { %234 = vbcast.lane.b32.xlu1 %v232_v31, 256  ;;  %223 = vbcast.lane.b32.xlu0 %v221_v32, 256 }
  0x77   :  { %216 = vbcast.lane.b32.xlu1 %v210_v29, 264  ;;  %205 = vbcast.lane.b32.xlu0 %v199_v30, 264 }
  0x7b   :  { %238 = vbcast.lane.b32.xlu1 %v232_v31, 264  ;;  %227 = vbcast.lane.b32.xlu0 %v221_v32, 264 }
  0xb1   :  { %v92_v34 = vpop.permute.xlu1 %91  ;;  %v70_v35 = vpop.permute.xlu0 %69 }
  0xb2   :  { %vm244_vm0 = vcmp.eq.s32.totalorder %v92_v34, %v2012_v33  ;;  %vm240_vm1 = vcmp.eq.s32.totalorder %v70_v35, %v2012_v33 }
  0xb3   :  { %v1485_v37 = vsel %vm244_vm0, 1.0, %v1915_v36  ;;  %v1481_v38 = vsel %vm240_vm1, 1.0, %v1915_v36  ;;  %vm2104_vm1 = vmor %vm436_vm10, %vm437_vm11 }
  0xb4   :  { %v2018_v39 = vpack.c.bf16 %v1485_v37, %v1485_v37  ;;  %v2020_v40 = vpack.c.bf16 %v1481_v38, %v1481_v38 }
  0xb5   :  { %v103_v41 = vpop.permute.xlu1 %102  ;;  %v81_v42 = vpop.permute.xlu0 %80 }
  0xb6   :  { %v468_v43 = vshrl.u32 %v2018_v39, 16  ;;  %v471_v44 = vshll.u32 %v2018_v39, 16  ;;  %vm246_vm2 = vcmp.eq.s32.totalorder %v103_v41, %v2012_v33  ;;  %vm242_vm3 = vcmp.eq.s32.totalorder %v81_v42, %v2012_v33 }
  0xb7   :  { %v440_v47 = vshrl.u32 %v2020_v40, 16  ;;  %v1487_v48 = vsel %vm246_vm2, 1.0, %v1915_v36  ;;  %v1583_v49 = vrot.slane %v2018_v39, 9  ;;  %v1483_v51 = vsel %vm242_vm3, 1.0, %v1915_v36 }
  0xb8   :  { %v470_v45 = vrot.slane %v468_v43, 4  ;;  %v473_v46 = vrot.slane %v471_v44, 5  ;;  %v2029_v50 = vpack.c.bf16 %v1487_v48, %v1487_v48  ;;  %v443_v54 = vshll.u32 %v2020_v40, 16 }
  0xb9   :  { %v85_v52 = vpop.permute.xlu1 %84  ;;  %v74_v53 = vpop.permute.xlu0 %73  ;;  %v1621_v55 = vpack.c.bf16 %v1483_v51, %v1483_v51  ;;  %v2038_v60 = vrot.slane %v440_v47, 4  ;;  %v1581_v61 = vrot.slane %v2020_v40, 9  ;;  %v1652_v62 = vpack.c.bf16 %v1487_v48, %v1485_v37  ;;  %v1812_v40 = vld [vmem:[#allocation7] sm:$0xff]  }
  0xba   :  { %vm243_vm7 = vcmp.eq.s32.totalorder %v85_v52, %v2012_v33  ;;  %vm241_vm8 = vcmp.eq.s32.totalorder %v74_v53, %v2012_v33  ;;  %v474_v56 = vor.u32 %v473_v46, %v470_v45  ;;  %v482_v57 = vshrl.u32 %v2029_v50, 16 }
  0xbb   :  { %v485_v58 = vshll.u32 %v2029_v50, 16  ;;  %v1484_v59 = vsel %vm243_vm7, 1.0, %v1915_v36  ;;  %v454_v63 = vshrl.u32 %v1621_v55, 16  ;;  %v1482_v3 = vsel %vm241_vm8, 1.0, %v1915_v36 }
  0xbc   :  { %v484_v0 = vrot.slane %v482_v57, 4  ;;  %v1622_v2 = vpack.c.bf16 %v1484_v59, %v1484_v59  ;;  %v2042_v6 = vrot.slane %v443_v54, 5  ;;  %v457_v7 = vshll.u32 %v1621_v55, 16 }
  0xbd   :  { %v487_v1 = vrot.slane %v485_v58, 5  ;;  %v107_v4 = vpop.permute.xlu1 %106  ;;  %v96_v5 = vpop.permute.xlu0 %95  ;;  %v1620_v8 = vpack.c.bf16 %v1482_v3, %v1482_v3  ;;  %v1651_v11 = vpack.c.bf16 %v1483_v51, %v1481_v38  ;;  %v2044_v12 = vrot.slane %v474_v56, 4 }
  0xbe   :  { %v1584_v14 = vrot.slane %v2029_v50, 9  ;;  %vm247_vm9 = vcmp.eq.s32.totalorder %v107_v4, %v2012_v33  ;;  %v463_v16 = vshll.u32 %v1622_v2, 16  ;;  %v976_v17 = vrot.slane %v1622_v2, 5 }
  0xbf   :  { %v488_v13 = vor.u32 %v487_v1, %v484_v0  ;;  %1716 = vmatprep.mubr.msk.bf16.mxu0 %vm704_vm5, %v1651_v11  ;;  %v1488_v18 = vsel %vm247_vm9, 1.0, %v1915_v36  ;;  %vm245_vm12 = vcmp.eq.s32.totalorder %v96_v5, %v2012_v33  ;;  %v456_v19 = vrot.slane %v454_v63, 4 }
  0xc0   :  { %v1582_v20 = vrot.slane %v1621_v55, 9  ;;  %v449_v22 = vshll.u32 %v1620_v8, 16  ;;  %1717 = vmatmul.mubr.msk.bf16.vlgmr.msra.gmra.mrb[0].mxu0 %vm704_vm5, %v1652_v62  ;;  %v1626_v23 = vpack.c.bf16 %v1488_v18, %v1488_v18  ;;  %v459_v26 = vrot.slane %v457_v7, 5 }
  0xc1   :  { %v125_v24 = vpop.permute.xlu1 %124  ;;  %v114_v25 = vpop.permute.xlu0 %113  ;;  %v972_v27 = vrot.slane %v1620_v8, 5  ;;  %v1486_v29 = vsel %vm245_vm12, 1.0, %v1915_v36  ;;  %1733 = vmatpush3.bf16.msra.mxu0 %v2008_v28  ;;  %v2061_v30 = vrot.slane %v488_v13, 4  ;;  %v465_v35 = vrot.slane %v463_v16, 5 }
  0xc2   :  { %vm250_vm14 = vcmp.eq.s32.totalorder %v125_v24, %v2012_v33  ;;  %v984_v31 = vrot.slane %v1626_v23, 5  ;;  %v1624_v32 = vpack.c.bf16 %v1486_v29, %v1486_v29  ;;  %1734 = vmatprep.subr.bf16.mxu0 %v1811_v15  ;;  %v2066_v37 = vsel %vm2053_vm13, %v1582_v20, %v976_v17 }
  0xc3   :  { %v1491_v34 = vsel %vm250_vm14, 1.0, %v1915_v36  ;;  %vm248_vm15 = vcmp.eq.s32.totalorder %v114_v25, %v2012_v33  ;;  %v451_v41 = vrot.slane %v449_v22, 5  ;;  %v491_v42 = vshll.u32 %v1626_v23, 16 }
  0xc4   :  { %v2068_v38 = vpack.c.bf16 %v1491_v34, %v1491_v34  ;;  %v980_v43 = vrot.slane %v1624_v32, 5  ;;  %v446_v44 = vor.u32 %v2042_v6, %v2038_v60  ;;  %v1489_v48 = vsel %vm248_vm15, 1.0, %v1915_v36 }
  0xc5   :  { %v147_v28 = vpop.permute.xlu1 %146  ;;  %v136_v45 = vpop.permute.xlu0 %135  ;;  %v460_v50 = vor.u32 %v459_v26, %v456_v19  ;;  %1735 = vmatpush3.bf16.msra.mxu0 %v1811_v15  ;;  %v2078_v51 = vsel %vm2053_vm13, %v1584_v14, %v984_v31  ;;  %v477_v52 = vshll.u32 %v1624_v32, 16  ;;  %v2080_v53 = vpack.c.bf16 %v1489_v48, %v1489_v48 }
  0xc6   :  { %v510_v46 = vshrl.u32 %v2068_v38, 16  ;;  %v513_v47 = vshll.u32 %v2068_v38, 16  ;;  %v1653_v54 = vpack.c.bf16 %v1491_v34, %v1489_v48  ;;  %v2086_v55 = vsel %vm2053_vm13, %v1583_v49, %v980_v43 }
  0xc7   :  { %vm254_vm0 = vcmp.eq.s32.totalorder %v147_v28, %v2012_v33  ;;  %v2093_v58 = vsel %vm2053_vm13, %v1581_v61, %v972_v27  ;;  %v493_v59 = vrot.slane %v491_v42, 5  ;;  %v496_v60 = vshrl.u32 %v2080_v53, 16 }
  0xc8   :  { %v512_v56 = vrot.slane %v510_v46, 4  ;;  %v515_v57 = vrot.slane %v513_v47, 5  ;;  %v1495_v62 = vsel %vm254_vm0, 1.0, %v1915_v36  ;;  %1720 = vmatprep.mubr.msk.bf16.mxu0 %vm704_vm5, %v1653_v54  ;;  %v1586_v63 = vrot.slane %v2068_v38, 9 }
  0xc9   :  { %v129_v39 = vpop.permute.xlu1 %128  ;;  %v118_v49 = vpop.permute.xlu0 %117  ;;  %v499_v0 = vshll.u32 %v2080_v53, 16  ;;  %v2100_v1 = vpack.c.bf16 %v1495_v62, %v1495_v62  ;;  %v461_v61 = vrot.slane %v460_v50, 4  ;;  %v479_v2 = vrot.slane %v477_v52, 5 }
  0xca   :  { %v1598_v3 = vcombine.low %v2086_v55, %v2078_v51  ;;  %v447_v4 = vrot.slane %v446_v44, 4  ;;  %vm252_vm2 = vcmp.eq.s32.totalorder %v136_v45, %v2012_v33  ;;  %v516_v5 = vor.u32 %v515_v57, %v512_v56 }
  0xcb   :  { %v538_v6 = vshrl.u32 %v2100_v1, 16  ;;  %v541_v7 = vshll.u32 %v2100_v1, 16  ;;  %vm251_vm3 = vcmp.eq.s32.totalorder %v129_v39, %v2012_v33  ;;  %v498_v8 = vrot.slane %v496_v60, 4 }
  0xcc   :  { %v452_v11 = vsel %vm2104_vm1, %v447_v4, %v451_v41  ;;  %v466_v13 = vsel %vm2104_vm1, %v461_v61, %v465_v35  ;;  %v1493_v14 = vsel %vm252_vm2, 1.0, %v1915_v36  ;;  %v501_v17 = vrot.slane %v499_v0, 5 }
  0xcd   :  { %v151_v15 = vpop.permute.xlu1 %150  ;;  %v140_v16 = vpop.permute.xlu0 %139  ;;  %v540_v18 = vrot.slane %v538_v6, 4  ;;  %v1545_v19 = vcombine.low %v452_v11, %v466_v13  ;;  %v2119_v20 = vpack.c.bf16 %v1493_v14, %v1493_v14  ;;  %v543_v22 = vrot.slane %v541_v7, 5 }
  0xce   :  { %v1654_v23 = vpack.c.bf16 %v1495_v62, %v1493_v14  ;;  %v1492_v24 = vsel %vm251_vm3, 1.0, %v1915_v36  ;;  %v480_v25 = vsel %vm2104_vm1, %v2044_v12, %v479_v2  ;;  %v2125_v26 = vrot.slane %v516_v5, 4 }
  0xcf   :  { %v1585_v27 = vrot.slane %v2080_v53, 9  ;;  %1696 = vmatprep.mubr.msk.bf16.mxu1 %vm704_vm5, %v1545_v19  ;;  %v524_v29 = vshrl.u32 %v2119_v20, 16  ;;  %v527_v31 = vshll.u32 %v2119_v20, 16  ;;  %v1630_v32 = vpack.c.bf16 %v1492_v24, %v1492_v24 }
  0xd0   :  { %v494_v34 = vsel %vm2104_vm1, %v2061_v30, %v493_v59  ;;  %vm249_vm4 = vcmp.eq.s32.totalorder %v118_v49, %v2012_v33  ;;  %1721 = vmatmul.mubr.msk.bf16.gmra.mrb[4].mxu0 %vm704_vm5, %v1654_v23  ;;  %vm255_vm6 = vcmp.eq.s32.totalorder %v151_v15, %v2012_v33  ;;  %v502_v41 = vor.u32 %v501_v17, %v498_v8 }
  0xd1   :  { %v169_v12 = vpop.permute.xlu1 %168  ;;  %v158_v35 = vpop.permute.xlu0 %157  ;;  %v526_v42 = vrot.slane %v524_v29, 4  ;;  %v529_v43 = vrot.slane %v527_v31, 5  ;;  %v1546_v28 = vcombine.low %v480_v25, %v494_v34  ;;  %v544_v44 = vor.u32 %v543_v22, %v540_v18 }
  0xd2   :  { %v519_v45 = vshll.u32 %v1630_v32, 16  ;;  %v1490_v46 = vsel %vm249_vm4, 1.0, %v1915_v36  ;;  %v1496_v47 = vsel %vm255_vm6, 1.0, %v1915_v36  ;;  %v992_v48 = vrot.slane %v1630_v32, 5 }
  0xd3   :  { %1697 = vmatmul.mubr.msk.bf16.vlgmr.msra.gmra.mrb[0].mxu1 %vm704_vm5, %v1546_v28  ;;  %v1628_v30 = vpack.c.bf16 %v1490_v46, %v1490_v46  ;;  %v1634_v50 = vpack.c.bf16 %v1496_v47, %v1496_v47  ;;  %vm253_vm7 = vcmp.eq.s32.totalorder %v140_v16, %v2012_v33  ;;  %v1588_v52 = vrot.slane %v2100_v1, 9 }
  0xd4   :  { %v530_v53 = vor.u32 %v529_v43, %v526_v42  ;;  %v1494_v54 = vsel %vm253_vm7, 1.0, %v1915_v36  ;;  %vm258_vm8 = vcmp.eq.s32.totalorder %v169_v12, %v2012_v33  ;;  %1762 = vmatpush3.bf16.msra.mxu1 %v1995_v9  ;;  %v503_v59 = vrot.slane %v502_v41, 4 }
  0xd5   :  { %v191_v56 = vpop.permute.xlu1 %190  ;;  %v180_v57 = vpop.permute.xlu0 %179  ;;  %v1587_v60 = vrot.slane %v2119_v20, 9  ;;  %v505_v62 = vshll.u32 %v1628_v30, 16  ;;  %v988_v39 = vrot.slane %v1628_v30, 5  ;;  %1761 = vmatprep.subr.bf16.mxu1 %v1997_v10  ;;  %v547_v49 = vshll.u32 %v1634_v50, 16 }
  0xd6   :  { %v1632_v0 = vpack.c.bf16 %v1494_v54, %v1494_v54  ;;  %v1499_v1 = vsel %vm258_vm8, 1.0, %v1915_v36  ;;  %vm256_vm9 = vcmp.eq.s32.totalorder %v158_v35, %v2012_v33  ;;  %v545_v61 = vrot.slane %v544_v44, 4 }
  0xd7   :  { %v521_v2 = vrot.slane %v519_v45, 5  ;;  %v2153_v9 = vsel %vm2053_vm13, %v1586_v63, %v992_v48  ;;  %v2155_v4 = vpack.c.bf16 %v1499_v1, %v1499_v1  ;;  %v531_v5 = vrot.slane %v530_v53, 4 }
  0xd8   :  { %v507_v6 = vrot.slane %v505_v62, 5  ;;  %v533_v7 = vshll.u32 %v1632_v0, 16  ;;  %v1497_v8 = vsel %vm256_vm9, 1.0, %v1915_v36  ;;  %1763 = vmatpush3.bf16.msra.mxu1 %v1997_v10  ;;  %v1000_v13 = vrot.slane %v1634_v50, 5 }
  0xd9   :  { %v173_v11 = vpop.permute.xlu1 %172  ;;  %v566_v14 = vshrl.u32 %v2155_v4, 16  ;;  %v569_v15 = vshll.u32 %v2155_v4, 16  ;;  %v2161_v38 = vpack.c.bf16 %v1497_v8, %v1497_v8  ;;  %v162_v16 = vpop.permute.xlu0 %161  ;;  %1752 = vmatprep.subr.bf16.mxu1 %v1915_v36  ;;  %v2166_v63 = vsel %vm2053_vm13, %v1585_v27, %v988_v39 }
  0xda   :  { %v549_v17 = vrot.slane %v547_v49, 5  ;;  %v1655_v18 = vpack.c.bf16 %v1499_v1, %v1497_v8  ;;  %vm262_vm10 = vcmp.eq.s32.totalorder %v191_v56, %v2012_v33  ;;  %v535_v19 = vrot.slane %v533_v7, 5 }
  0xdb   :  { %v568_v10 = vrot.slane %v566_v14, 4  ;;  %v571_v20 = vrot.slane %v569_v15, 5  ;;  %v552_v22 = vshrl.u32 %v2161_v38, 16  ;;  %v555_v23 = vshll.u32 %v2161_v38, 16 }
  0xdc   :  { %v1503_v24 = vsel %vm262_vm10, 1.0, %v1915_v36  ;;  %v508_v25 = vsel %vm2104_vm1, %v503_v59, %v507_v6  ;;  %v522_v27 = vsel %vm2104_vm1, %v2125_v26, %v521_v2  ;;  %1724 = vmatprep.mubr.msk.bf16.mxu0 %vm704_vm5, %v1655_v18  ;;  %v2180_v29 = vsel %vm2053_vm13, %v1588_v52, %v1000_v13 }
  0xdd   :  { %v996_v31 = vrot.slane %v1632_v0, 5  ;;  %v1590_v32 = vrot.slane %v2155_v4, 9  ;;  %v2183_v34 = vpack.c.bf16 %v1503_v24, %v1503_v24  ;;  %v195_v12 = vpop.permute.xlu1 %194  ;;  %v572_v35 = vor.u32 %v571_v20, %v568_v10  ;;  %v184_v44 = vpop.permute.xlu0 %183 }
  0xde   :  { %v1547_v41 = vcombine.low %v508_v25, %v522_v27  ;;  %vm260_vm11 = vcmp.eq.s32.totalorder %v180_v57, %v2012_v33  ;;  %vm259_vm12 = vcmp.eq.s32.totalorder %v173_v11, %v2012_v33  ;;  %v554_v42 = vrot.slane %v552_v22, 4 }
  0xdf   :  { %v594_v26 = vshrl.u32 %v2183_v34, 16  ;;  %v597_v43 = vshll.u32 %v2183_v34, 16  ;;  %v536_v28 = vsel %vm2104_vm1, %v531_v5, %v535_v19  ;;  %v557_v45 = vrot.slane %v555_v23, 5 }
  0xe0   :  { %1700 = vmatprep.mubr.msk.bf16.mxu1 %vm704_vm5, %v1547_v41  ;;  %v1501_v46 = vsel %vm260_vm11, 1.0, %v1915_v36  ;;  %v1500_v47 = vsel %vm259_vm12, 1.0, %v1915_v36  ;;  %v550_v48 = vsel %vm2104_vm1, %v545_v61, %v549_v17  ;;  %v2198_v30 = vsel %vm2053_vm13, %v1587_v60, %v996_v31 }
  0xe1   :  { %v596_v50 = vrot.slane %v594_v26, 4  ;;  %v599_v52 = vrot.slane %v597_v43, 5  ;;  %v2200_v53 = vpack.c.bf16 %v1501_v46, %v1501_v46  ;;  %v1656_v54 = vpack.c.bf16 %v1503_v24, %v1501_v46  ;;  %v213_v0 = vpop.permute.xlu1 %212  ;;  %v202_v11 = vpop.permute.xlu0 %201 }
  0xe2   :  { %v1638_v56 = vpack.c.bf16 %v1500_v47, %v1500_v47  ;;  %v1548_v57 = vcombine.low %v536_v28, %v550_v48  ;;  %vm257_vm14 = vcmp.eq.s32.totalorder %v162_v16, %v2012_v33  ;;  %v2203_v59 = vrot.slane %v572_v35, 4 }
  0xe3   :  { %v1589_v62 = vrot.slane %v2161_v38, 9  ;;  %v580_v39 = vshrl.u32 %v2200_v53, 16  ;;  %v583_v49 = vshll.u32 %v2200_v53, 16  ;;  %v558_v60 = vor.u32 %v557_v45, %v554_v42  ;;  %1725 = vmatmul.mubr.msk.bf16.gmra.mrb[8].mxu0 %vm704_vm5, %v1656_v54 }
  0xe4   :  { %v1592_v1 = vrot.slane %v2183_v34, 9  ;;  %1701 = vmatmul.mubr.msk.bf16.gmra.mrb[4].mxu1 %vm704_vm5, %v1548_v57  ;;  %v1498_v61 = vsel %vm257_vm14, 1.0, %v1915_v36  ;;  %v1597_v2 = vcombine.low %v2093_v58, %v2066_v37  ;;  %v600_v5 = vor.u32 %v599_v52, %v596_v50 }
  0xe5   :  { %v582_v6 = vrot.slane %v580_v39, 4  ;;  %v585_v7 = vrot.slane %v583_v49, 5  ;;  %v1636_v8 = vpack.c.bf16 %v1498_v61, %v1498_v61  ;;  %v575_v13 = vshll.u32 %v1638_v56, 16  ;;  %v235_v22 = vpop.permute.xlu1 %234  ;;  %v224_v41 = vpop.permute.xlu0 %223 }
  0xe6   :  { %v1008_v14 = vrot.slane %v1638_v56, 5  ;;  %1736 = vmatprep.mubr.msk.bf16.mxu0 %vm704_vm5, %v1597_v2  ;;  %vm263_vm15 = vcmp.eq.s32.totalorder %v195_v12, %v2012_v33  ;;  %vm261_vm0 = vcmp.eq.s32.totalorder %v184_v44, %v2012_v33  ;;  %vm266_vm2 = vcmp.eq.s32.totalorder %v213_v0, %v2012_v33 }
  0xe7   :  { %v586_v15 = vor.u32 %v585_v7, %v582_v6  ;;  %v561_v38 = vshll.u32 %v1636_v8, 16  ;;  %v1004_v16 = vrot.slane %v1636_v8, 5  ;;  %v1504_v17 = vsel %vm263_vm15, 1.0, %v1915_v36 }
  0xe8   :  { %v1642_v18 = vpack.c.bf16 %v1504_v17, %v1504_v17  ;;  %v1502_v37 = vsel %vm261_vm0, 1.0, %v1915_v36  ;;  %vm264_vm3 = vcmp.eq.s32.totalorder %v202_v11, %v2012_v33  ;;  %v559_v58 = vrot.slane %v558_v60, 4 }
  0xe9   :  { %v601_v19 = vrot.slane %v600_v5, 4  ;;  %v1591_v10 = vrot.slane %v2200_v53, 9  ;;  %v1640_v20 = vpack.c.bf16 %v1502_v37, %v1502_v37  ;;  %v577_v23 = vrot.slane %v575_v13, 5  ;;  %v206_v39 = vpop.permute.xlu0 %205 }
  0xea   :  { %v603_v24 = vshll.u32 %v1642_v18, 16  ;;  %v2223_v25 = vsel %vm266_vm2, 1.0, %v1915_v36  ;;  %v2226_v27 = vsel %vm264_vm3, 1.0, %v1915_v36  ;;  %v563_v31 = vrot.slane %v561_v38, 5 }
  0xeb   :  { %v589_v34 = vshll.u32 %v1640_v20, 16  ;;  %v2230_v12 = vpack.c.bf16 %v2223_v25, %v2223_v25  ;;  %v2234_v35 = vpack.c.bf16 %v2226_v27, %v2226_v27  ;;  %v587_v42 = vrot.slane %v586_v15, 4  ;;  %1737 = vmatmul.mubr.msk.bf16.vlgmr.msra.gmra.mrb[0].mxu0 %vm704_vm5, %v1598_v3 }
  0xec   :  { %v2240_v26 = vsel %vm2053_vm13, %v1590_v32, %v1008_v14  ;;  %v2244_v43 = vsel %vm2053_vm13, %v1589_v62, %v1004_v16  ;;  %v1599_v28 = vcombine.low %v2166_v63, %v2153_v9  ;;  %v1016_v44 = vrot.slane %v1642_v18, 5  ;;  %v217_v9 = vpop.permute.xlu1 %216 }
  0xed   :  { %v1012_v45 = vrot.slane %v1640_v20, 5  ;;  %v622_v4 = vshrl.u32 %v2230_v12, 16  ;;  %v625_v46 = vshll.u32 %v2230_v12, 16  ;;  %v605_v32 = vrot.slane %v603_v24, 5 }
  0xee   :  { %v591_v47 = vrot.slane %v589_v34, 5  ;;  %v608_v48 = vshrl.u32 %v2234_v35, 16  ;;  %v611_v50 = vshll.u32 %v2234_v35, 16  ;;  %1740 = vmatprep.mubr.msk.bf16.mxu0 %vm704_vm5, %v1599_v28  ;;  %vm270_vm4 = vcmp.eq.s32.totalorder %v235_v22, %v2012_v33  ;;  %v228_v22 = vpop.permute.xlu0 %227 }
  0xef   :  { %v624_v51 = vrot.slane %v622_v4, 4  ;;  %v627_v55 = vrot.slane %v625_v46, 5  ;;  %v564_v3 = vsel %vm2104_vm1, %v559_v58, %v563_v31  ;;  %v2261_v53 = vsel %vm270_vm4, 1.0, %v1915_v36 }
  0xf0   :  { %v610_v63 = vrot.slane %v608_v48, 4  ;;  %v613_v52 = vrot.slane %v611_v50, 5  ;;  %v578_v54 = vsel %vm2104_vm1, %v2203_v59, %v577_v23  ;;  %v2268_v56 = vsel %vm2053_vm13, %v1592_v1, %v1016_v44  ;;  %v239_v20 = vpop.permute.xlu1 %238 }
  0xf1   :  { %v2272_v57 = vpack.c.bf16 %v2261_v53, %v2261_v53  ;;  %v1549_v62 = vcombine.low %v564_v3, %v578_v54  ;;  %vm268_vm6 = vcmp.eq.s32.totalorder %v224_v41, %v2012_v33  ;;  %v2277_v49 = vsel %vm2053_vm13, %v1591_v10, %v1012_v45 }
  0xf2   :  { %v628_v0 = vor.u32 %v627_v55, %v624_v51  ;;  %v2280_v60 = vsel %vm268_vm6, 1.0, %v1915_v36  ;;  %vm267_vm7 = vcmp.eq.s32.totalorder %v217_v9, %v2012_v33  ;;  %v1594_v59 = vrot.slane %v2230_v12, 9 }
  0xf3   :  { %v650_v1 = vshrl.u32 %v2272_v57, 16  ;;  %v653_v61 = vshll.u32 %v2272_v57, 16  ;;  %1704 = vmatprep.mubr.msk.bf16.mxu1 %vm704_vm5, %v1549_v62  ;;  %v592_v2 = vsel %vm2104_vm1, %v587_v42, %v591_v47  ;;  %v614_v5 = vor.u32 %v613_v52, %v610_v63 }
  0xf4   :  { %v1593_v6 = vrot.slane %v2234_v35, 9  ;;  %v1647_v7 = vpack.c.bf16 %v2280_v60, %v2280_v60  ;;  %v1508_v8 = vsel %vm267_vm7, 1.0, %v1915_v36  ;;  %v606_v15 = vsel %vm2104_vm1, %v601_v19, %v605_v32 }
  0xf5   :  { %v652_v11 = vrot.slane %v650_v1, 4  ;;  %v655_v13 = vrot.slane %v653_v61, 5  ;;  %v1646_v14 = vpack.c.bf16 %v1508_v8, %v1508_v8  ;;  %v629_v38 = vrot.slane %v628_v0, 4 }
  0xf6   :  { %v636_v16 = vshrl.u32 %v1647_v7, 16  ;;  %v639_v17 = vshll.u32 %v1647_v7, 16  ;;  %v1550_v18 = vcombine.low %v592_v2, %v606_v15  ;;  %v1596_v37 = vrot.slane %v2272_v57, 9 }
  0xf7   :  { %v631_v58 = vshll.u32 %v1646_v14, 16  ;;  %v1024_v10 = vrot.slane %v1646_v14, 5  ;;  %vm265_vm8 = vcmp.eq.s32.totalorder %v206_v39, %v2012_v33  ;;  %v1600_v19 = vcombine.low %v2198_v30, %v2180_v29 }
  0xf8   :  { %v638_v23 = vrot.slane %v636_v16, 4  ;;  %v641_v24 = vrot.slane %v639_v17, 5  ;;  %1705 = vmatmul.mubr.msk.bf16.gmra.mrb[8].mxu1 %vm704_vm5, %v1550_v18  ;;  %v1506_v31 = vsel %vm265_vm8, 1.0, %v1915_v36  ;;  %v615_v34 = vrot.slane %v614_v5, 4  ;;  %v1813_v5 = vld [vmem:[#allocation7 + $0x8] sm:$0xff]  }
  0xf9   :  { %v656_v12 = vor.u32 %v655_v13, %v652_v11  ;;  %v633_v35 = vrot.slane %v631_v58, 5  ;;  %v1644_v41 = vpack.c.bf16 %v1506_v31, %v1506_v31  ;;  %1741 = vmatmul.mubr.msk.bf16.gmra.mrb[4].mxu0 %vm704_vm5, %v1600_v19  ;;  %v1601_v28 = vcombine.low %v2244_v43, %v2240_v26 }
  0xfa   :  { %v642_v42 = vor.u32 %v641_v24, %v638_v23  ;;  %vm271_vm9 = vcmp.eq.s32.totalorder %v239_v20, %v2012_v33  ;;  %vm269_vm10 = vcmp.eq.s32.totalorder %v228_v22, %v2012_v33  ;;  %v1595_v30 = vrot.slane %v1647_v7, 9 }
  0xfb   :  { %v617_v44 = vshll.u32 %v1644_v41, 16  ;;  %v1020_v45 = vrot.slane %v1644_v41, 5  ;;  %v1512_v4 = vsel %vm271_vm9, 1.0, %v1915_v36  ;;  %v1510_v29 = vsel %vm269_vm10, 1.0, %v1915_v36  ;;  %1744 = vmatprep.mubr.msk.bf16.mxu0 %vm704_vm5, %v1601_v28 }
  0xfc   :  { %v1025_v46 = vsel %vm2053_vm13, %v1594_v59, %v1024_v10  ;;  %v1650_v32 = vpack.c.bf16 %v1512_v4, %v1512_v4  ;;  %v1648_v47 = vpack.c.bf16 %v1510_v29, %v1510_v29  ;;  %v657_v48 = vrot.slane %v656_v12, 4 }
  0xfd   :  { %v619_v26 = vrot.slane %v617_v44, 5  ;;  %v1021_v43 = vsel %vm2053_vm13, %v1593_v6, %v1020_v45  ;;  %v634_v33 = vsel %vm2104_vm1, %v629_v38, %v633_v35  ;;  %v643_v9 = vrot.slane %v642_v42, 4 }
  0xfe   :  { %v659_v50 = vshll.u32 %v1650_v32, 16  ;;  %v1032_v51 = vrot.slane %v1650_v32, 5  ;;  %v645_v55 = vshll.u32 %v1648_v47, 16  ;;  %v1028_v3 = vrot.slane %v1648_v47, 5 }
  0xff   :  { %v1602_v63 = vcombine.low %v2277_v49, %v2268_v56  ;;  %v1603_v52 = vcombine.low %v1021_v43, %v1025_v46  ;;  %v620_v54 = vsel %vm2104_vm1, %v615_v34, %v619_v26  ;;  %v1657_v2 = vpack.c.bf16 %v2223_v25, %v2226_v27 }
 0x100   :  { %v661_v57 = vrot.slane %v659_v50, 5  ;;  %v1033_v62 = vsel %vm2053_vm13, %v1596_v37, %v1032_v51  ;;  %v647_v39 = vrot.slane %v645_v55, 5  ;;  %v1029_v0 = vsel %vm2053_vm13, %v1595_v30, %v1028_v3 }
 0x101   :  { %v1551_v59 = vcombine.low %v620_v54, %v634_v33  ;;  %v1604_v1 = vcombine.low %v1029_v0, %v1033_v62  ;;  %1745 = vmatmul.mubr.msk.bf16.gmra.mrb[8].mxu0 %vm704_vm5, %v1602_v63  ;;  %v1658_v21 = vpack.c.bf16 %v2261_v53, %v2280_v60  ;;  %vm1916_vm13 = vmmov 0  }
 0x102   :  { %v648_v61 = vsel %vm2104_vm1, %v643_v9, %v647_v39  ;;  %v662_v56 = vsel %vm2104_vm1, %v657_v48, %v661_v57  ;;  %1748 = vmatprep.mubr.msk.bf16.mxu0 %vm704_vm5, %v1603_v52  ;;  %vm1383_vm1 = vcmask 1041409   ;;  %vm1385_vm11 = vcmask 1042434  }
 0x103   :  { %1708 = vmatprep.mubr.msk.bf16.mxu1 %vm704_vm5, %v1551_v59  ;;  %v1552_v49 = vcombine.low %v648_v61, %v662_v56  ;;  %vm1387_vm12 = vcmask 1043459   ;;  %vm1389_vm14 = vcmask 1044484   ;;  %vm1391_vm15 = vcmask 1045509  }
 0x104   :  { %vm1393_vm0 = vcmask 1046534   ;;  %vm1395_vm2 = vcmask 1047559  }
 0x105   :  { %1709 = vmatmul.mubr.msk.bf16.gmra.mrb[12].mxu1 %vm704_vm5, %v1552_v49 }
 0x106   :  { %1728 = vmatprep.mubr.msk.bf16.mxu1 %vm704_vm5, %v1657_v2 }
 0x109   :  { %1749 = vmatmul.mubr.msk.bf16.gmra.mrb[12].mxu0 %vm704_vm5, %v1604_v1 }
 0x111   :  { %1729 = vmatmul.mubr.msk.bf16.vlgmr.msra.gmra.mrb[12].mxu1 %vm704_vm5, %v1658_v21 }
 0x112   :  { %1756 = vmatprep.mubr.msk.bf16.mxu1 %vm1916_vm13, %v1915_v36  ;;  %1753 = vmatpush3.bf16.msra.mxu1 %v1812_v40 }
 0x113   :  { %1754 = vmatprep.subr.bf16.mxu1 %v1915_v36 }
 0x116   :  { %1755 = vmatpush3.bf16.msra.mxu1 %v1813_v5 }
 0x1a6   :  { %v1698_v25 = vpop.f32.mrb[0].mxu1 }
 0x1a7   :  { %v763_v27 = vpop.f32.mrb[1].mxu1 }
 0x1a8   :  { %v1699_v6 = vpop.f32.mrb[2].mxu1 }
 0x1a9   :  { %v766_v7 = vpop.f32.mrb[3].mxu1 }
 0x1b7   :  { %v1702_v8 = vpop.f32.mrb[4].mxu1 }
 0x1b8   :  { %v779_v11 = vpop.f32.mrb[5].mxu1 }
 0x1b9   :  { %v1703_v13 = vpop.f32.mrb[6].mxu1 }
 0x1ba   :  { %v782_v14 = vpop.f32.mrb[7].mxu1 }
 0x1be   :  { %v1738_v53 = vpop.f32.mrb[0].mxu0 }
 0x1bf   :  { %v1764_v60 = vadd.f32 %v1738_v53, %v1698_v25  ;;  %v1133_v15 = vpop.f32.mrb[1].mxu0 }
 0x1c0   :  { %v1765_v38 = vadd.f32 %v1133_v15, %v763_v27  ;;  %v1739_v16 = vpop.f32.mrb[2].mxu0 }
 0x1c1   :  { %v1226_v17 = vsel %vm704_vm5, %v1764_v60, -inf  ;;  %v1766_v18 = vadd.f32 %v1739_v16, %v1699_v6  ;;  %v1136_v37 = vpop.f32.mrb[3].mxu0 }
 0x1c2   :  { %v1227_v58 = vrot.slane %v1226_v17, 4  ;;  %v1212_v36 = vsel %vm704_vm5, %v1765_v38, -inf  ;;  %v1767_v10 = vadd.f32 %v1136_v37, %v766_v7 }
 0x1c3   :  { %v1213_v20 = vrot.slane %v1212_v36, 4  ;;  %v1233_v22 = vsel %vm704_vm5, %v1766_v18, -inf }
 0x1c4   :  { %v1228_v23 = vmax.f32 %v1226_v17, %v1227_v58  ;;  %v1234_v24 = vrot.slane %v1233_v22, 4  ;;  %v1219_v31 = vsel %vm704_vm5, %v1767_v10, -inf }
 0x1c5   :  { %v1214_v19 = vmax.f32 %v1212_v36, %v1213_v20  ;;  %v1220_v34 = vrot.slane %v1219_v31, 4 }
 0x1c6   :  { %v1229_v12 = vrot.slane %v1228_v23, 2  ;;  %v1235_v35 = vmax.f32 %v1233_v22, %v1234_v24 }
 0x1c7   :  { %v1215_v41 = vrot.slane %v1214_v19, 2  ;;  %v1221_v42 = vmax.f32 %v1219_v31, %v1220_v34 }
 0x1c8   :  { %v1230_v28 = vmax.f32 %v1228_v23, %v1229_v12  ;;  %v1236_v44 = vrot.slane %v1235_v35, 2 }
 0x1c9   :  { %v1216_v45 = vmax.f32 %v1214_v19, %v1215_v41  ;;  %v1222_v4 = vrot.slane %v1221_v42, 2 }
 0x1ca   :  { %v1231_v29 = vrot.slane %v1230_v28, 1  ;;  %v1237_v30 = vmax.f32 %v1235_v35, %v1236_v44 }
 0x1cb   :  { %v1706_v46 = vpop.f32.mrb[8].mxu1  ;;  %v1217_v32 = vrot.slane %v1216_v45, 1  ;;  %v1223_v47 = vmax.f32 %v1221_v42, %v1222_v4 }
 0x1cc   :  { %v795_v48 = vpop.f32.mrb[9].mxu1  ;;  %v1232_v26 = vmax.f32 %v1230_v28, %v1231_v29  ;;  %v1238_v43 = vrot.slane %v1237_v30, 1  ;;  %v1742_v33 = vpop.f32.mrb[4].mxu0 }
 0x1cd   :  { %v1707_v50 = vpop.f32.mrb[10].mxu1  ;;  %v1218_v51 = vmax.f32 %v1216_v45, %v1217_v32  ;;  %v1224_v55 = vrot.slane %v1223_v47, 1  ;;  %v1768_v3 = vadd.f32 %v1742_v33, %v1702_v8  ;;  %v1149_v9 = vpop.f32.mrb[5].mxu0 }
 0x1ce   :  { %v798_v63 = vpop.f32.mrb[11].mxu1  ;;  %v1326_v52 = vpack.c.bf16 %v1232_v26, %v1232_v26  ;;  %v1239_v54 = vmax.f32 %v1237_v30, %v1238_v43  ;;  %v1769_v57 = vadd.f32 %v1149_v9, %v779_v11  ;;  %v1743_v62 = vpop.f32.mrb[6].mxu0 }
 0x1cf   :  { %v1324_v39 = vpack.c.bf16 %v1218_v51, %v1218_v51  ;;  %v1225_v0 = vmax.f32 %v1223_v47, %v1224_v55  ;;  %v1254_v59 = vsel %vm704_vm5, %v1768_v3, -inf  ;;  %v1770_v1 = vadd.f32 %v1743_v62, %v1703_v13  ;;  %v1152_v61 = vpop.f32.mrb[7].mxu0 }
 0x1d0   :  { %v1327_v56 = vpack.c.bf16 %v1239_v54, %v1239_v54  ;;  %v1255_v49 = vrot.slane %v1254_v59, 4  ;;  %v1240_v2 = vsel %vm704_vm5, %v1769_v57, -inf  ;;  %v1771_v6 = vadd.f32 %v1152_v61, %v782_v14 }
 0x1d1   :  { %v1325_v21 = vpack.c.bf16 %v1225_v0, %v1225_v0  ;;  %v1241_v40 = vrot.slane %v1240_v2, 4  ;;  %v1261_v5 = vsel %vm704_vm5, %v1770_v1, -inf  ;;  %v1369_v7 = vunpack.c.l.b16 %v1326_v52 }
 0x1d2   :  { %v1256_v25 = vmax.f32 %v1254_v59, %v1255_v49  ;;  %v1262_v27 = vrot.slane %v1261_v5, 4  ;;  %v1367_v8 = vunpack.c.l.b16 %v1324_v39  ;;  %v1370_v13 = vunpack.c.l.b16 %v1327_v56 }
 0x1d3   :  { %v1368_v11 = vunpack.c.l.b16 %v1325_v21  ;;  %v1242_v53 = vmax.f32 %v1240_v2, %v1241_v40  ;;  %v1247_v38 = vsel %vm704_vm5, %v1771_v6, -inf }
 0x1d4   :  { %v1257_v60 = vrot.slane %v1256_v25, 2  ;;  %v1263_v15 = vmax.f32 %v1261_v5, %v1262_v27  ;;  %v1746_v16 = vpop.f32.mrb[8].mxu0  ;;  %v1248_v37 = vrot.slane %v1247_v38, 4 }
 0x1d5   :  { %v1384_v17 = vsel %vm1383_vm1, %v1368_v11, %v1367_v8  ;;  %v1243_v18 = vrot.slane %v1242_v53, 2  ;;  %v1772_v58 = vadd.f32 %v1746_v16, %v1706_v46  ;;  %v1165_v36 = vpop.f32.mrb[9].mxu0 }
 0x1d6   :  { %v1386_v10 = vsel %vm1385_vm11, %v1369_v7, %v1384_v17  ;;  %v1258_v20 = vmax.f32 %v1256_v25, %v1257_v60  ;;  %v1264_v14 = vrot.slane %v1263_v15, 2  ;;  %v1773_v22 = vadd.f32 %v1165_v36, %v795_v48  ;;  %v1747_v23 = vpop.f32.mrb[10].mxu0 }
 0x1d7   :  { %v1244_v24 = vmax.f32 %v1242_v53, %v1243_v18  ;;  %v1388_v31 = vsel %vm1387_vm12, %v1370_v13, %v1386_v10  ;;  %v1249_v19 = vmax.f32 %v1247_v38, %v1248_v37  ;;  %v1282_v34 = vsel %vm704_vm5, %v1772_v58, -inf  ;;  %v1168_v12 = vpop.f32.mrb[11].mxu0 }
 0x1d8   :  { %v1259_v35 = vrot.slane %v1258_v20, 1  ;;  %v1265_v41 = vmax.f32 %v1263_v15, %v1264_v14  ;;  %v1283_v42 = vrot.slane %v1282_v34, 4  ;;  %v1268_v28 = vsel %vm704_vm5, %v1773_v22, -inf }
 0x1d9   :  { %v1245_v44 = vrot.slane %v1244_v24, 1  ;;  %v1250_v45 = vrot.slane %v1249_v19, 2  ;;  %v1269_v4 = vrot.slane %v1268_v28, 4  ;;  %v1774_v29 = vadd.f32 %v1747_v23, %v1707_v50 }
 0x1da   :  { %v1266_v30 = vrot.slane %v1265_v41, 1  ;;  %v1284_v46 = vmax.f32 %v1282_v34, %v1283_v42  ;;  %v1775_v32 = vadd.f32 %v1168_v12, %v798_v63  ;;  %v1260_v33 = vmax.f32 %v1258_v20, %v1259_v35 }
 0x1db   :  { %v1246_v47 = vmax.f32 %v1244_v24, %v1245_v44  ;;  %v1251_v48 = vmax.f32 %v1249_v19, %v1250_v45  ;;  %v1270_v26 = vmax.f32 %v1268_v28, %v1269_v4  ;;  %v1289_v43 = vsel %vm704_vm5, %v1774_v29, -inf }
 0x1dc   :  { %v1285_v51 = vrot.slane %v1284_v46, 2  ;;  %v1290_v55 = vrot.slane %v1289_v43, 4  ;;  %v1750_v3 = vpop.f32.mrb[12].mxu0  ;;  %v1275_v57 = vsel %vm704_vm5, %v1775_v32, -inf  ;;  %v1267_v50 = vmax.f32 %v1265_v41, %v1266_v30 }
 0x1dd   :  { %v1328_v9 = vpack.c.bf16 %v1246_v47, %v1246_v47  ;;  %v1252_v52 = vrot.slane %v1251_v48, 1  ;;  %v1271_v54 = vrot.slane %v1270_v26, 2  ;;  %v1181_v62 = vpop.f32.mrb[13].mxu0  ;;  %v1276_v56 = vrot.slane %v1275_v57, 4 }
 0x1de   :  { %v1286_v39 = vmax.f32 %v1284_v46, %v1285_v51  ;;  %v1291_v0 = vmax.f32 %v1289_v43, %v1290_v55  ;;  %v1751_v63 = vpop.f32.mrb[14].mxu0  ;;  %v1330_v2 = vpack.c.bf16 %v1260_v33, %v1260_v33  ;;  %v1331_v7 = vpack.c.bf16 %v1267_v50, %v1267_v50 }
 0x1df   :  { %v1371_v59 = vunpack.c.l.b16 %v1328_v9  ;;  %v1253_v1 = vmax.f32 %v1251_v48, %v1252_v52  ;;  %v1272_v61 = vmax.f32 %v1270_v26, %v1271_v54  ;;  %v1184_v49 = vpop.f32.mrb[15].mxu0  ;;  %v1277_v6 = vmax.f32 %v1275_v57, %v1276_v56 }
 0x1e0   :  { %v1287_v21 = vrot.slane %v1286_v39, 1  ;;  %v1292_v40 = vrot.slane %v1291_v0, 2  ;;  %v1373_v18 = vunpack.c.l.b16 %v1330_v2  ;;  %v1374_v20 = vunpack.c.l.b16 %v1331_v7 }
 0x1e1   :  { %v1390_v5 = vsel %vm1389_vm14, %v1371_v59, %v1388_v31  ;;  %v1329_v25 = vpack.c.bf16 %v1253_v1, %v1253_v1  ;;  %v1273_v27 = vrot.slane %v1272_v61, 1  ;;  %v1278_v13 = vrot.slane %v1277_v6, 2 }
 0x1e2   :  { %v1293_v8 = vmax.f32 %v1291_v0, %v1292_v40  ;;  %v1288_v53 = vmax.f32 %v1286_v39, %v1287_v21 }
 0x1e3   :  { %v1372_v11 = vunpack.c.l.b16 %v1329_v25  ;;  %v1274_v15 = vmax.f32 %v1272_v61, %v1273_v27  ;;  %v1279_v58 = vmax.f32 %v1277_v6, %v1278_v13 }
 0x1e4   :  { %v1730_v60 = vpop.f32.mrb[12].mxu1  ;;  %v1294_v38 = vrot.slane %v1293_v8, 1  ;;  %v1334_v31 = vpack.c.bf16 %v1288_v53, %v1288_v53 }
 0x1e5   :  { %v1776_v16 = vadd.f32 %v1750_v3, %v1730_v60  ;;  %v952_v17 = vpop.f32.mrb[13].mxu1  ;;  %v1392_v37 = vsel %vm1391_vm15, %v1372_v11, %v1390_v5  ;;  %v1280_v19 = vrot.slane %v1279_v58, 1  ;;  %v1332_v35 = vpack.c.bf16 %v1274_v15, %v1274_v15 }
 0x1e6   :  { %v1777_v36 = vadd.f32 %v1181_v62, %v952_v17  ;;  %v1731_v10 = vpop.f32.mrb[14].mxu1  ;;  %v1295_v14 = vmax.f32 %v1293_v8, %v1294_v38  ;;  %v1394_v29 = vsel %vm1393_vm0, %v1373_v18, %v1392_v37  ;;  %v1377_v57 = vunpack.c.l.b16 %v1334_v31 }
 0x1e7   :  { %v1310_v22 = vsel %vm704_vm5, %v1776_v16, -inf  ;;  %v1778_v23 = vadd.f32 %v1751_v63, %v1731_v10  ;;  %v955_v24 = vpop.f32.mrb[15].mxu1  ;;  %v1281_v44 = vmax.f32 %v1279_v58, %v1280_v19  ;;  %v1396_v47 = vsel %vm1395_vm2, %v1374_v20, %v1394_v29  ;;  %v1615_v58 = vld [vmem:[%s2392_s3] ss:$0 sm:$0xff] }
 0x1e8   :  { %v1311_v34 = vrot.slane %v1310_v22, 4  ;;  %v1296_v12 = vsel %vm704_vm5, %v1777_v36, -inf  ;;  %v1779_v28 = vadd.f32 %v1184_v49, %v955_v24  ;;  %v1335_v30 = vpack.c.bf16 %v1295_v14, %v1295_v14 }
 0x1e9   :  { %v1297_v41 = vrot.slane %v1296_v12, 4  ;;  %v1317_v42 = vsel %vm704_vm5, %v1778_v23, -inf  ;;  %v1333_v48 = vpack.c.bf16 %v1281_v44, %v1281_v44  ;;  %v1375_v51 = vunpack.c.l.b16 %v1332_v35 }
 0x1ea   :  { %v1312_v45 = vmax.f32 %v1310_v22, %v1311_v34  ;;  %v1318_v4 = vrot.slane %v1317_v42, 4  ;;  %v1303_v32 = vsel %vm704_vm5, %v1779_v28, -inf  ;;  %v1378_v62 = vunpack.c.l.b16 %v1335_v30 }
 0x1eb   :  { %v1298_v46 = vmax.f32 %v1296_v12, %v1297_v41  ;;  %v1304_v33 = vrot.slane %v1303_v32, 4  ;;  %v1376_v3 = vunpack.c.l.b16 %v1333_v48 }
 0x1ec   :  { %v1313_v26 = vrot.slane %v1312_v45, 2  ;;  %v1319_v43 = vmax.f32 %v1317_v42, %v1318_v4 }
 0x1ed   :  { %v1299_v55 = vrot.slane %v1298_v46, 2  ;;  %v1305_v54 = vmax.f32 %v1303_v32, %v1304_v33  ;;  %v1397_v39 = vsel %vm1383_vm1, %v1376_v3, %v1375_v51 }
 0x1ee   :  { %v1314_v9 = vmax.f32 %v1312_v45, %v1313_v26  ;;  %v1320_v52 = vrot.slane %v1319_v43, 2  ;;  %v1398_v1 = vsel %vm1385_vm11, %v1377_v57, %v1397_v39 }
 0x1ef   :  { %v1300_v50 = vmax.f32 %v1298_v46, %v1299_v55  ;;  %v1306_v59 = vrot.slane %v1305_v54, 2  ;;  %v1399_v56 = vsel %vm1387_vm12, %v1378_v62, %v1398_v1 }
 0x1f0   :  { %v1315_v0 = vrot.slane %v1314_v9, 1  ;;  %v1321_v63 = vmax.f32 %v1319_v43, %v1320_v52 }
 0x1f1   :  { %v1301_v61 = vrot.slane %v1300_v50, 1  ;;  %v1307_v2 = vmax.f32 %v1305_v54, %v1306_v59 }
 0x1f2   :  { %v1322_v49 = vrot.slane %v1321_v63, 1  ;;  %v1316_v21 = vmax.f32 %v1314_v9, %v1315_v0 }
 0x1f3   :  { %v1302_v40 = vmax.f32 %v1300_v50, %v1301_v61  ;;  %v1308_v25 = vrot.slane %v1307_v2, 1 }
 0x1f4   :  { %v1323_v5 = vmax.f32 %v1321_v63, %v1322_v49  ;;  %v1338_v7 = vpack.c.bf16 %v1316_v21, %v1316_v21 }
 0x1f5   :  { %v1336_v27 = vpack.c.bf16 %v1302_v40, %v1302_v40  ;;  %v1309_v6 = vmax.f32 %v1307_v2, %v1308_v25 }
 0x1f6   :  { %v1339_v11 = vpack.c.bf16 %v1323_v5, %v1323_v5  ;;  %v1381_v15 = vunpack.c.l.b16 %v1338_v7 }
 0x1f7   :  { %v1379_v8 = vunpack.c.l.b16 %v1336_v27  ;;  %v1337_v53 = vpack.c.bf16 %v1309_v6, %v1309_v6 }
 0x1f8   :  { %v1382_v38 = vunpack.c.l.b16 %v1339_v11 }
 0x1f9   :  { %v1400_v13 = vsel %vm1389_vm14, %v1379_v8, %v1399_v56  ;;  %v1380_v60 = vunpack.c.l.b16 %v1337_v53 }
 0x1fb   :  { %v1401_v16 = vsel %vm1391_vm15, %v1380_v60, %v1400_v13 }
 0x1fc   :  { %v1402_v17 = vsel %vm1393_vm0, %v1381_v15, %v1401_v16 }
 0x1fd   :  { %v1403_v18 = vsel %vm1395_vm2, %v1382_v38, %v1402_v17 }
 0x1fe   :  { %v1404_v37 = vpack.c.b16 %v1403_v18, %v1396_v47 }
 0x200   :  { %1757 = vmatmul.mubr.msk.bf16.vlgmr.msra.gmra.mrb[16].mxu1 %vm704_vm5, %v1404_v37 }
 0x2d3   :  { %v1454_v36 = vpop.f32.mrb[16].mxu1 }
 0x2d4   :  { %v1455_v10 = vadd.f32 %v1615_v58, %v1454_v36  ;;  %v1758_v20 = vpop.f32.mrb[17].mxu1 }
 0x2d5   :  { %v1457_v14 = vpop.f32.mrb[18].mxu1 }
 0x2d6   :  { %1461 = vst [vmem:[#allocation8] sm:$0xff] %v1455_v10  ;;  %v1458_v22 = vadd.f32 %v1615_v58, %v1457_v14  ;;  %v1759_v23 = vpop.f32.mrb[19].mxu1 }
 0x2d8   :  { %1462 = vst [vmem:[#allocation8 + $0x8] sm:$0xff] %v1458_v22 }
 0x2d9   :  { %1891 = shalt.err (!%p1888_p0)
}
 0x2da   :  { %s1892_s6 = scalar_lea.hbm %s2393_s4, 256 }
 0x2db   :  { %p1893_p1 = scmp.ne.s32.totalorder %s2393_s4, %s1892_s6  ;;  %p1896_p2 = scmp.lt.u32.totalorder %s1892_s6, %s2393_s4 }
 0x2dd   :  { %p1898_p3 = pnand %p1896_p2, %p1893_p1 }
 0x2df   :  { %1901 = shalt.err (!%p1898_p3)
}
 0x2e0   :  { %1474 = dma.vmem_to_hbm [thread:$0]  %s1469_s29, 256, %s2393_s4, [#allocation4], %s1912_s1, %s1912_s1, %s1913_s13  }
 0x2e1   :  { %1906 = dma.done.wait [#allocation4], 256  }
 0x2e2   :  { %1907 = vsyncadd [#allocation4], 4294967040 }
 0x2e3   :  { %1478 = vsyncpa [#allocation3], 1 }
 0x2e4   :  { %1479 = vsyncpa [#allocation6], 1 }
 0x2e5   :  { %1480 = vsyncpa [#allocation4], 1 }

</bundles_post_ra>
